<compile_context>
chip_gen: v7x
topology: tpu7x:2x2x1
jax: 0.10.0
libtpu: 0.0.40
codegen_flags: <defaults>
</compile_context>

<pallas_src>
import math

import jax
import jax.numpy as jnp
from jax import lax
from jax.experimental import pallas as pl
from jax.experimental.pallas import tpu as pltpu

BN_EPS = 1e-5
LANE = 128  # channel dims padded up to a full lane width


def _pad_to(n, m):
    return ((n + m - 1) // m) * m


# --------------------------------------------------------------------------
# in-kernel helpers (traced inside the Pallas kernel)
# --------------------------------------------------------------------------
def _gelu(x):
    # TODO(synk): tanh approximation of nn.GELU's default erf form.
    c = 0.7978845608028654  # sqrt(2/pi)
    return 0.5 * x * (1.0 + jnp.tanh(c * (x + 0.044715 * x * x * x)))


def _batchnorm_train(h, gamma, beta):
    mean = jnp.mean(h, axis=0, keepdims=True)
    var = jnp.mean(jnp.square(h - mean), axis=0, keepdims=True)
    return (h - mean) * lax.rsqrt(var + BN_EPS) * gamma + beta


# --------------------------------------------------------------------------
# fused kernel: all experts in one step
#   x_ref    : (B, F)
#   w1_ref   : (F, n*Hp)            -- experts' first Linear, concatenated on lanes
#   vec1_ref : (3, n*Hp)            -- rows = [b1, bn1_gamma, bn1_beta]
#   w2_ref   : (n*Hp, n*Ep)         -- block-diagonal second Linear
#   vec2_ref : (3, n*Ep)            -- rows = [b2, bn2_gamma, bn2_beta]
#   out_ref  : (B, n*Ep)            -- lane-dense; wrapper slices per-expert
# --------------------------------------------------------------------------
def expert_attention_kernel(x_ref, w1_ref, vec1_ref, w2_ref, vec2_ref, out_ref):
    x = x_ref[...]

    # Linear1 (all experts at once) -> BN -> GELU -> (Dropout=identity)
    h = jnp.dot(x, w1_ref[...], preferred_element_type=jnp.float32) + vec1_ref[0:1, :]
    h = _gelu(_batchnorm_train(h, vec1_ref[1:2, :], vec1_ref[2:3, :]))
    # TODO(synk): Dropout treated as identity (eval semantics).

    # Linear2 (block-diagonal) -> BN -> GELU -> (Dropout=identity)
    h = jnp.dot(h, w2_ref[...], preferred_element_type=jnp.float32) + vec2_ref[0:1, :]
    h = _gelu(_batchnorm_train(h, vec2_ref[1:2, :], vec2_ref[2:3, :]))

    out_ref[...] = h.astype(out_ref.dtype)


def expert_attention_forward(packed, x):
    """use_att=False path: towers = [expert_i(x) for i in range(n_expert)]."""
    B, F = x.shape
    n_expert = packed["n_expert"]
    E = packed["expert_dim"]
    Ep = packed["e_pad"]

    out = pl.pallas_call(
        expert_attention_kernel,
        out_shape=jax.ShapeDtypeStruct((B, n_expert * Ep), jnp.float32),
        in_specs=[pl.BlockSpec(memory_space=pltpu.MemorySpace.VMEM)] * 5,
        out_specs=pl.BlockSpec(memory_space=pltpu.MemorySpace.VMEM),
    )(x, packed["w1"], packed["vec1"], packed["w2"], packed["vec2"])

    # Slice the real (B, E) towers back out of the lane-dense output.
    return [out[:, i * Ep: i * Ep + E] for i in range(n_expert)]


# --------------------------------------------------------------------------
# deterministic parameter init (mirrors nn.Linear / BatchNorm1d shapes; Linear
# weights stored transposed as (in_features, out_features) so y = x @ W + b)
# --------------------------------------------------------------------------
def init_params(seed, feature_dim, expert_dim, n_expert, hidden_dim=100):
    key = jax.random.PRNGKey(seed)
    keys = iter(jax.random.split(key, 8 * n_expert + 4))

    def linear(din, dout):
        k1, k2 = jax.random.split(next(keys))
        bound = 1.0 / math.sqrt(din)
        w = jax.random.uniform(k1, (din, dout), jnp.float32, -bound, bound)
        b = jax.random.uniform(k2, (1, dout), jnp.float32, -bound, bound)
        return w, b

    def norm(dim):
        return jnp.ones((1, dim), jnp.float32), jnp.zeros((1, dim), jnp.float32)

    experts = []
    for _ in range(n_expert):
        w1, b1 = linear(feature_dim, hidden_dim)
        g1, be1 = norm(hidden_dim)
        w2, b2 = linear(hidden_dim, expert_dim)
        g2, be2 = norm(expert_dim)
        experts.append(dict(w1=w1, b1=b1, g1=g1, be1=be1,
                            w2=w2, b2=b2, g2=g2, be2=be2))
    return experts


def pack_params(experts):
    """One-time host-side prep:
      * w1 of all experts zero-padded (hidden -> 128 lanes) and concatenated
        along the output dim -> (F, n*Hp)
      * w2 embedded into a block-diagonal (n*Hp, n*Ep) matrix (E padded to 128)
      * per-expert small vectors packed into (3, lanes) arrays per stage.
    Padding is numerically exact: padded channels stay identically zero."""
    n = len(experts)
    F, H = experts[0]["w1"].shape
    E = experts[0]["w2"].shape[1]
    Hp = _pad_to(H, LANE)
    Ep = _pad_to(E, LANE)

    w1 = jnp.zeros((F, n * Hp), jnp.float32)
    vec1 = jnp.zeros((3, n * Hp), jnp.float32).at[1].set(1.0)   # gamma pad = 1
    w2 = jnp.zeros((n * Hp, n * Ep), jnp.float32)
    vec2 = jnp.zeros((3, n * Ep), jnp.float32).at[1].set(1.0)   # gamma pad = 1

    for i, ep in enumerate(experts):
        h0, e0 = i * Hp, i * Ep
        w1 = w1.at[:, h0:h0 + H].set(ep["w1"])
        vec1 = vec1.at[0, h0:h0 + H].set(ep["b1"][0])
        vec1 = vec1.at[1, h0:h0 + H].set(ep["g1"][0])
        vec1 = vec1.at[2, h0:h0 + H].set(ep["be1"][0])
        w2 = w2.at[h0:h0 + H, e0:e0 + E].set(ep["w2"])
        vec2 = vec2.at[0, e0:e0 + E].set(ep["b2"][0])
        vec2 = vec2.at[1, e0:e0 + E].set(ep["g2"][0])
        vec2 = vec2.at[2, e0:e0 + E].set(ep["be2"][0])

    return dict(w1=w1, vec1=vec1, w2=w2, vec2=vec2,
                n_expert=n, expert_dim=E, e_pad=Ep)


# --------------------------------------------------------------------------
# pure-JAX reference (unpadded, per-expert), used only as a sanity check
# --------------------------------------------------------------------------
def expert_attention_reference(experts, x):
    towers = []
    for ep in experts:
        h = x @ ep["w1"] + ep["b1"]
        h = _gelu(_batchnorm_train(h, ep["g1"], ep["be1"]))
        h = h @ ep["w2"] + ep["b2"]
        h = _gelu(_batchnorm_train(h, ep["g2"], ep["be2"]))
        towers.append(h)
    return towers


if __name__ == "__main__":
    B, FEAT, EXP = 8, 16, 32       # batch, feature_dim, expert_dim
    N_TASK, N_EXPERT = 2, 3

    experts = init_params(0, FEAT, EXP, N_EXPERT)
    packed = pack_params(experts)

    x = jax.random.normal(jax.random.PRNGKey(0), (B, FEAT), jnp.float32)

    towers = expert_attention_forward(packed, x)
    towers = jax.block_until_ready(towers)

    assert len(towers) == N_EXPERT

    ref = expert_attention_reference(experts, x)
    for tw, r in zip(towers, ref):
        assert tw.shape == (B, EXP)
        assert bool(jnp.all(jnp.isfinite(tw)))
        assert bool(jnp.allclose(tw, r, rtol=1e-3, atol=1e-3)), \
            float(jnp.max(jnp.abs(tw - r)))

    print("KERNEL_OK")
</pallas_src>

<mosaic_0001>
module attributes {stable_mosaic.version = 11 : i64} {
  func.func @expert_attention_kernel(%arg0: memref<8x16xf32, #tpu.memory_space<vmem>>, %arg1: memref<16x384xf32, #tpu.memory_space<vmem>>, %arg2: memref<3x384xf32, #tpu.memory_space<vmem>>, %arg3: memref<384x384xf32, #tpu.memory_space<vmem>>, %arg4: memref<3x384xf32, #tpu.memory_space<vmem>>, %arg5: memref<8x384xf32, #tpu.memory_space<vmem>>) attributes {dimension_semantics = [], scalar_prefetch = 0 : i64, scratch_operands = 0 : i64, tpu.core_type = #tpu.core_type<tc>} {
    %c0 = arith.constant 0 : index
    %c0_0 = arith.constant 0 : index
    %0 = vector.load %arg0[%c0, %c0_0] : memref<8x16xf32, #tpu.memory_space<vmem>>, vector<8x16xf32>
    %c0_1 = arith.constant 0 : index
    %c0_2 = arith.constant 0 : index
    %1 = vector.load %arg1[%c0_1, %c0_2] : memref<16x384xf32, #tpu.memory_space<vmem>>, vector<16x384xf32>
    %cst = arith.constant dense<0.000000e+00> : vector<8x384xf32>
    %2 = tpu.matmul %0, %1, %cst {dimension_numbers = #tpu.dot_dimension_numbers<[1], [0], [0], [1], [0, 0, 1, 1], [], []>} : vector<8x16xf32>, vector<16x384xf32>, vector<8x384xf32> -> vector<8x384xf32>
    %c0_3 = arith.constant 0 : index
    %c0_4 = arith.constant 0 : index
    %3 = vector.load %arg2[%c0_3, %c0_4] : memref<3x384xf32, #tpu.memory_space<vmem>>, vector<1x384xf32>
    %4 = vector.broadcast %3 : vector<1x384xf32> to vector<8x384xf32>
    %5 = arith.addf %2, %4 : vector<8x384xf32>
    %c1 = arith.constant 1 : index
    %c0_5 = arith.constant 0 : index
    %6 = vector.load %arg2[%c1, %c0_5] : memref<3x384xf32, #tpu.memory_space<vmem>>, vector<1x384xf32>
    %c2 = arith.constant 2 : index
    %c0_6 = arith.constant 0 : index
    %7 = vector.load %arg2[%c2, %c0_6] : memref<3x384xf32, #tpu.memory_space<vmem>>, vector<1x384xf32>
    %cst_7 = arith.constant dense<0.000000e+00> : vector<384xf32>
    %8 = vector.multi_reduction <add>, %5, %cst_7 [0] : vector<8x384xf32> to vector<384xf32>
    %9 = vector.shape_cast %8 : vector<384xf32> to vector<1x384xf32>
    %cst_8 = arith.constant 8.000000e+00 : f32
    %10 = vector.broadcast %cst_8 : f32 to vector<1x384xf32>
    %11 = arith.divf %9, %10 : vector<1x384xf32>
    %12 = vector.broadcast %11 : vector<1x384xf32> to vector<8x384xf32>
    %13 = arith.subf %5, %12 : vector<8x384xf32>
    %14 = arith.mulf %13, %13 : vector<8x384xf32>
    %cst_9 = arith.constant dense<0.000000e+00> : vector<384xf32>
    %15 = vector.multi_reduction <add>, %14, %cst_9 [0] : vector<8x384xf32> to vector<384xf32>
    %16 = vector.shape_cast %15 : vector<384xf32> to vector<1x384xf32>
    %cst_10 = arith.constant 8.000000e+00 : f32
    %17 = vector.broadcast %cst_10 : f32 to vector<1x384xf32>
    %18 = arith.divf %16, %17 : vector<1x384xf32>
    %19 = vector.broadcast %11 : vector<1x384xf32> to vector<8x384xf32>
    %20 = arith.subf %5, %19 : vector<8x384xf32>
    %cst_11 = arith.constant 9.99999974E-6 : f32
    %21 = vector.broadcast %cst_11 : f32 to vector<1x384xf32>
    %22 = arith.addf %18, %21 : vector<1x384xf32>
    %23 = math.rsqrt %22 : vector<1x384xf32>
    %24 = vector.broadcast %23 : vector<1x384xf32> to vector<8x384xf32>
    %25 = arith.mulf %20, %24 : vector<8x384xf32>
    %26 = vector.broadcast %6 : vector<1x384xf32> to vector<8x384xf32>
    %27 = arith.mulf %25, %26 : vector<8x384xf32>
    %28 = vector.broadcast %7 : vector<1x384xf32> to vector<8x384xf32>
    %29 = arith.addf %27, %28 : vector<8x384xf32>
    %cst_12 = arith.constant 5.000000e-01 : f32
    %30 = vector.broadcast %cst_12 : f32 to vector<8x384xf32>
    %31 = arith.mulf %30, %29 : vector<8x384xf32>
    %cst_13 = arith.constant 4.471500e-02 : f32
    %32 = vector.broadcast %cst_13 : f32 to vector<8x384xf32>
    %33 = arith.mulf %32, %29 : vector<8x384xf32>
    %34 = arith.mulf %33, %29 : vector<8x384xf32>
    %35 = arith.mulf %34, %29 : vector<8x384xf32>
    %36 = arith.addf %29, %35 : vector<8x384xf32>
    %cst_14 = arith.constant 0.797884583 : f32
    %37 = vector.broadcast %cst_14 : f32 to vector<8x384xf32>
    %38 = arith.mulf %37, %36 : vector<8x384xf32>
    %39 = math.tanh %38 : vector<8x384xf32>
    %cst_15 = arith.constant 1.000000e+00 : f32
    %40 = vector.broadcast %cst_15 : f32 to vector<8x384xf32>
    %41 = arith.addf %40, %39 : vector<8x384xf32>
    %42 = arith.mulf %31, %41 : vector<8x384xf32>
    %c0_16 = arith.constant 0 : index
    %c0_17 = arith.constant 0 : index
    %43 = vector.load %arg3[%c0_16, %c0_17] : memref<384x384xf32, #tpu.memory_space<vmem>>, vector<384x384xf32>
    %cst_18 = arith.constant dense<0.000000e+00> : vector<8x384xf32>
    %44 = tpu.matmul %42, %43, %cst_18 {dimension_numbers = #tpu.dot_dimension_numbers<[1], [0], [0], [1], [0, 0, 1, 1], [], []>} : vector<8x384xf32>, vector<384x384xf32>, vector<8x384xf32> -> vector<8x384xf32>
    %c0_19 = arith.constant 0 : index
    %c0_20 = arith.constant 0 : index
    %45 = vector.load %arg4[%c0_19, %c0_20] : memref<3x384xf32, #tpu.memory_space<vmem>>, vector<1x384xf32>
    %46 = vector.broadcast %45 : vector<1x384xf32> to vector<8x384xf32>
    %47 = arith.addf %44, %46 : vector<8x384xf32>
    %c1_21 = arith.constant 1 : index
    %c0_22 = arith.constant 0 : index
    %48 = vector.load %arg4[%c1_21, %c0_22] : memref<3x384xf32, #tpu.memory_space<vmem>>, vector<1x384xf32>
    %c2_23 = arith.constant 2 : index
    %c0_24 = arith.constant 0 : index
    %49 = vector.load %arg4[%c2_23, %c0_24] : memref<3x384xf32, #tpu.memory_space<vmem>>, vector<1x384xf32>
    %cst_25 = arith.constant dense<0.000000e+00> : vector<384xf32>
    %50 = vector.multi_reduction <add>, %47, %cst_25 [0] : vector<8x384xf32> to vector<384xf32>
    %51 = vector.shape_cast %50 : vector<384xf32> to vector<1x384xf32>
    %cst_26 = arith.constant 8.000000e+00 : f32
    %52 = vector.broadcast %cst_26 : f32 to vector<1x384xf32>
    %53 = arith.divf %51, %52 : vector<1x384xf32>
    %54 = vector.broadcast %53 : vector<1x384xf32> to vector<8x384xf32>
    %55 = arith.subf %47, %54 : vector<8x384xf32>
    %56 = arith.mulf %55, %55 : vector<8x384xf32>
    %cst_27 = arith.constant dense<0.000000e+00> : vector<384xf32>
    %57 = vector.multi_reduction <add>, %56, %cst_27 [0] : vector<8x384xf32> to vector<384xf32>
    %58 = vector.shape_cast %57 : vector<384xf32> to vector<1x384xf32>
    %cst_28 = arith.constant 8.000000e+00 : f32
    %59 = vector.broadcast %cst_28 : f32 to vector<1x384xf32>
    %60 = arith.divf %58, %59 : vector<1x384xf32>
    %61 = vector.broadcast %53 : vector<1x384xf32> to vector<8x384xf32>
    %62 = arith.subf %47, %61 : vector<8x384xf32>
    %cst_29 = arith.constant 9.99999974E-6 : f32
    %63 = vector.broadcast %cst_29 : f32 to vector<1x384xf32>
    %64 = arith.addf %60, %63 : vector<1x384xf32>
    %65 = math.rsqrt %64 : vector<1x384xf32>
    %66 = vector.broadcast %65 : vector<1x384xf32> to vector<8x384xf32>
    %67 = arith.mulf %62, %66 : vector<8x384xf32>
    %68 = vector.broadcast %48 : vector<1x384xf32> to vector<8x384xf32>
    %69 = arith.mulf %67, %68 : vector<8x384xf32>
    %70 = vector.broadcast %49 : vector<1x384xf32> to vector<8x384xf32>
    %71 = arith.addf %69, %70 : vector<8x384xf32>
    %cst_30 = arith.constant 5.000000e-01 : f32
    %72 = vector.broadcast %cst_30 : f32 to vector<8x384xf32>
    %73 = arith.mulf %72, %71 : vector<8x384xf32>
    %cst_31 = arith.constant 4.471500e-02 : f32
    %74 = vector.broadcast %cst_31 : f32 to vector<8x384xf32>
    %75 = arith.mulf %74, %71 : vector<8x384xf32>
    %76 = arith.mulf %75, %71 : vector<8x384xf32>
    %77 = arith.mulf %76, %71 : vector<8x384xf32>
    %78 = arith.addf %71, %77 : vector<8x384xf32>
    %cst_32 = arith.constant 0.797884583 : f32
    %79 = vector.broadcast %cst_32 : f32 to vector<8x384xf32>
    %80 = arith.mulf %79, %78 : vector<8x384xf32>
    %81 = math.tanh %80 : vector<8x384xf32>
    %cst_33 = arith.constant 1.000000e+00 : f32
    %82 = vector.broadcast %cst_33 : f32 to vector<8x384xf32>
    %83 = arith.addf %82, %81 : vector<8x384xf32>
    %84 = arith.mulf %73, %83 : vector<8x384xf32>
    %c0_34 = arith.constant 0 : index
    %c0_35 = arith.constant 0 : index
    %85 = vector.load %arg5[%c0_34, %c0_35] : memref<8x384xf32, #tpu.memory_space<vmem>>, vector<8x384xf32>
    tpu.vector_store %arg5[%c0_34, %c0_35], %84 {strides = array<i32>} : memref<8x384xf32, #tpu.memory_space<vmem>>, vector<8x384xf32>,
    return
  }
}

</mosaic_0001>

<bundles_post_ra>
// kernel: tpu_custom_call.1
= control target key start
LH: loop header
LB: loop body
LE: loop exit
PB: predicated region body
PF: predicated region fallthrough
CT: control target
= control target key end

     0   :  { %10 = vsyncpa [#allocation3], 0  ;;  %s1534_s0 = inlined_call_operand.hbm [shape: f32[8,16], index: 0, kind: input, shape index: {}]   ;;  %s1535_s1 = inlined_call_operand.hbm [shape: f32[16,384], index: 1, kind: input, shape index: {}]   ;;  %s1536_s2 = inlined_call_operand.hbm [shape: f32[3,384], index: 2, kind: input, shape index: {}]   ;;  %s1537_s3 = inlined_call_operand.hbm [shape: f32[384,384], index: 3, kind: input, shape index: {}]   ;;  %s1538_s4 = inlined_call_operand.vmem [shape: f32[3,384], index: 4, kind: input, shape index: {}]   ;;  %s1539_s5 = inlined_call_operand.hbm [shape: f32[8,384], index: 5, kind: output, shape index: {}]  }
   0x1   :  { %11 = vsyncpa [#allocation6], 0 }
   0x2   :  { %12 = vsyncpa [#allocation9], 0 }
   0x3   :  { %13 = vsyncpa [#allocation4], 0  ;;  %s1373_s18 = smov [#allocation5]   ;;  %s1255_s22 = scalar_lea.hbm %s1535_s1, 768 }
   0x4   :  { %s29_s19 = sshll.u32 %s1373_s18, 4  ;;  %p1256_p0 = scmp.ne.s32.totalorder %s1535_s1, %s1255_s22  ;;  %s30_s19 = int_to_ptr.vmem [resolvable:$true] %s29_s19 }
   0x5   :  { %p1259_p1 = scmp.lt.u32.totalorder %s1255_s22, %s1535_s1 }
   0x7   :  { %p1261_p2 = pnand %p1259_p1, %p1256_p0 }
   0x9   :  { %1264 = shalt.err (!%p1261_p2)
}
   0xa   :  { %s1265_s27 = scalar_lea.vmem %s30_s19, 768  ;;  %p1270_p4 = scmp.lt.s32.totalorder %s30_s19, %s30_s19 }
   0xb   :  { %p1266_p3 = scmp.ne.s32.totalorder %s30_s19, %s1265_s27  ;;  %p1271_p5 = scmp.lt.s32.totalorder %s1265_s27, %s1265_s27 }
   0xd   :  { %p1272_p6 = por %p1271_p5, %p1270_p4 }
   0xf   :  { %p1273_p7 = pnand %p1272_p6, %p1266_p3 }
  0x11   :  { %1276 = shalt.err (!%p1273_p7)
}
  0x12   :  { %s1374_s28 = smov 384   ;;  %s1375_s29 = smov 24  }
  0x13   :  { %35 = dma.hbm_to_vmem [thread:$0]  %s1535_s1, 768, %s30_s19, [#allocation6], %s1374_s28, %s1374_s28, %s1375_s29  }
  0x14   :  { %s1376_s7 = smov [#allocation2]   ;;  %s1377_s9 = smov [#allocation7]  }
  0x15   :  { %s20_s8 = sshll.u32 %s1376_s7, 4  ;;  %s42_s10 = sshll.u32 %s1377_s9, 4  ;;  %s21_s8 = int_to_ptr.vmem [resolvable:$true] %s20_s8  ;;  %s43_s10 = int_to_ptr.vmem [resolvable:$true] %s42_s10 }
  0x16   :  { %s1277_s13 = scalar_lea.hbm %s1534_s0, 128 }
  0x17   :  { %p1278_p8 = scmp.ne.s32.totalorder %s1534_s0, %s1277_s13  ;;  %p1281_p9 = scmp.lt.u32.totalorder %s1277_s13, %s1534_s0 }
  0x19   :  { %p1283_p10 = pnand %p1281_p9, %p1278_p8 }
  0x1b   :  { %1286 = shalt.err (!%p1283_p10)
}
  0x1c   :  { %s1287_s1 = scalar_lea.vmem %s21_s8, 128  ;;  %p1292_p12 = scmp.lt.s32.totalorder %s21_s8, %s21_s8 }
  0x1d   :  { %p1288_p11 = scmp.ne.s32.totalorder %s21_s8, %s1287_s1  ;;  %p1293_p13 = scmp.lt.s32.totalorder %s1287_s1, %s1287_s1 }
  0x1f   :  { %p1294_p0 = por %p1293_p13, %p1292_p12 }
  0x21   :  { %p1295_p1 = pnand %p1294_p0, %p1288_p11 }
  0x23   :  { %1298 = shalt.err (!%p1295_p1)
}
  0x24   :  { %23 = dma.hbm_to_vmem [thread:$0]  %s1534_s0, 128, %s21_s8, [#allocation3]  }
  0x25   :  { %s1299_s22 = scalar_lea.hbm %s1536_s2, 192 }
  0x26   :  { %p1300_p2 = scmp.ne.s32.totalorder %s1536_s2, %s1299_s22  ;;  %p1303_p3 = scmp.lt.u32.totalorder %s1299_s22, %s1536_s2 }
  0x28   :  { %p1305_p4 = pnand %p1303_p3, %p1300_p2 }
  0x2a   :  { %1308 = shalt.err (!%p1305_p4)
}
  0x2b   :  { %s1309_s27 = scalar_lea.vmem %s43_s10, 192  ;;  %p1314_p6 = scmp.lt.s32.totalorder %s43_s10, %s43_s10 }
  0x2c   :  { %p1310_p5 = scmp.ne.s32.totalorder %s43_s10, %s1309_s27  ;;  %p1315_p7 = scmp.lt.s32.totalorder %s1309_s27, %s1309_s27 }
  0x2e   :  { %p1316_p8 = por %p1315_p7, %p1314_p6 }
  0x30   :  { %p1317_p9 = pnand %p1316_p8, %p1310_p5 }
  0x32   :  { %1320 = shalt.err (!%p1317_p9)
}
  0x33   :  { %45 = dma.hbm_to_vmem [thread:$0]  %s1536_s2, 192, %s43_s10, [#allocation6]  }
  0x34   :  { %s1378_s6 = smov [#allocation8]   ;;  %s1321_s11 = scalar_lea.hbm %s1537_s3, 18432 }
  0x35   :  { %s51_s7 = sshll.u32 %s1378_s6, 4  ;;  %p1322_p10 = scmp.ne.s32.totalorder %s1537_s3, %s1321_s11  ;;  %s52_s7 = int_to_ptr.vmem [resolvable:$true] %s51_s7 }
  0x36   :  { %p1325_p11 = scmp.lt.u32.totalorder %s1321_s11, %s1537_s3 }
  0x38   :  { %p1327_p12 = pnand %p1325_p11, %p1322_p10 }
  0x3a   :  { %1330 = shalt.err (!%p1327_p12)
}
  0x3b   :  { %s1331_s16 = scalar_lea.vmem %s52_s7, 18432  ;;  %p1336_p0 = scmp.lt.s32.totalorder %s52_s7, %s52_s7 }
  0x3c   :  { %p1332_p13 = scmp.ne.s32.totalorder %s52_s7, %s1331_s16  ;;  %p1337_p1 = scmp.lt.s32.totalorder %s1331_s16, %s1331_s16 }
  0x3e   :  { %p1338_p2 = por %p1337_p1, %p1336_p0 }
  0x40   :  { %p1339_p3 = pnand %p1338_p2, %p1332_p13 }
  0x42   :  { %1342 = shalt.err (!%p1339_p3)
}
  0x43   :  { %57 = dma.hbm_to_vmem [thread:$0]  %s1537_s3, 18432, %s52_s7, [#allocation9], %s1374_s28, %s1374_s28, %s1375_s29  }
  0x44   :  { %1365 = dma.done.wait [#allocation3], 128  }
  0x45   :  { %1366 = vsyncadd [#allocation3], 4294967168 }
  0x46   :  { %1367 = dma.done.wait [#allocation6], 960  }
  0x47   :  { %1368 = vsyncadd [#allocation6], 4294966336 }
  0x48   :  { %1369 = dma.done.wait [#allocation9], 18432  }
  0x49   :  { %1370 = vsyncadd [#allocation9], 4294948864  ;;  %v1379_v0 = vmov 0.0   ;;  %v74_v1 = vld [vmem:[#allocation5 + $0x8] sm:$0xff]  ;;  %v77_v2 = vld [vmem:[#allocation5 + $0x20] sm:$0xff]  ;;  %vm96_vm0 = vcmask 130048  }
  0x4a   :  { %164 = vmatprep.mubr.f32.mxu1 %v1379_v0  ;;  %v73_v3 = vld [vmem:[#allocation5] sm:$0xff]  ;;  %v1058_v4 = vpack.c.bf16 %v77_v2, %v74_v1  ;;  %v76_v5 = vld [vmem:[#allocation5 + $0x18] sm:$0xff]  ;;  %v75_v6 = vld [vmem:[#allocation5 + $0x10] sm:$0xff]  ;;  %v1380_v11 = vmov 0.0|0.0   ;;  %vm1381_vm1 = vmmov 0  }
  0x4b   :  { %v1060_v7 = vpack.c.bf16 %v76_v5, %v73_v3  ;;  %v78_v8 = vld [vmem:[#allocation5 + $0x28] sm:$0xff]  ;;  %v72_v9 = vld [vmem:[#allocation2] sm:$0xff] }
  0x4c   :  { %1059 = vmatprep.subr.bf16.mxu1 %v1058_v4  ;;  %v1063_v10 = vpack.c.bf16 %v78_v8, %v75_v6  ;;  %v369_v12 = vld [vmem:[#allocation8 + $0x8] sm:$0xff]  ;;  %v372_v13 = vld [vmem:[#allocation8 + $0x20] sm:$0xff]  ;;  %v371_v16 = vld [vmem:[#allocation8 + $0x18] sm:$0xff] }
  0x4d   :  { %1061 = vmatpush1.bf16.msra.mxu1 %v1060_v7  ;;  %v1065_v14 = vpack.c.bf16 %v372_v13, %v369_v12  ;;  %v368_v15 = vld [vmem:[#allocation8] sm:$0xff]  ;;  %v375_v18 = vld [vmem:[#allocation8 + $0x38] sm:$0xff]  ;;  %v378_v19 = vld [vmem:[#allocation8 + $0x50] sm:$0xff] }
  0x4e   :  { %1062 = vmatprep.subr.bf16.mxu1 %v1380_v11  ;;  %v1067_v17 = vpack.c.bf16 %v371_v16, %v368_v15  ;;  %v1069_v20 = vpack.c.bf16 %v378_v19, %v375_v18  ;;  %v374_v21 = vld [vmem:[#allocation8 + $0x30] sm:$0xff]  ;;  %v377_v22 = vld [vmem:[#allocation8 + $0x48] sm:$0xff]  ;;  %v384_v25 = vld [vmem:[#allocation8 + $0x80] sm:$0xff] }
  0x4f   :  { %1066 = vmatprep.subr.bf16.mxu0 %v1065_v14  ;;  %v1071_v23 = vpack.c.bf16 %v377_v22, %v374_v21  ;;  %v381_v24 = vld [vmem:[#allocation8 + $0x68] sm:$0xff]  ;;  %v380_v27 = vld [vmem:[#allocation8 + $0x60] sm:$0xff]  ;;  %v383_v28 = vld [vmem:[#allocation8 + $0x78] sm:$0xff] }
  0x50   :  { %957 = vmatmul.mubr.msk.f32.vlgmr.msra.gmra.mrb[0].mxu1 %vm96_vm0, %v72_v9  ;;  %1068 = vmatpush1.bf16.msra.mxu0 %v1067_v17  ;;  %v1073_v26 = vpack.c.bf16 %v384_v25, %v381_v24  ;;  %v1075_v29 = vpack.c.bf16 %v383_v28, %v380_v27  ;;  %v387_v30 = vld [vmem:[#allocation8 + $0x98] sm:$0xff]  ;;  %v390_v31 = vld [vmem:[#allocation8 + $0xb0] sm:$0xff]  ;;  %v389_v34 = vld [vmem:[#allocation8 + $0xa8] sm:$0xff] }
  0x51   :  { %1064 = vmatpush3.bf16.msra.mxu1 %v1063_v10  ;;  %1020 = vmatprep.mubr.msk.f32.mxu1 %vm1381_vm1, %v1379_v0  ;;  %v1077_v32 = vpack.c.bf16 %v390_v31, %v387_v30  ;;  %v386_v33 = vld [vmem:[#allocation8 + $0x90] sm:$0xff]  ;;  %v393_v36 = vld [vmem:[#allocation8 + $0xc8] sm:$0xff]  ;;  %v396_v37 = vld [vmem:[#allocation8 + $0xe0] sm:$0xff] }
  0x52   :  { %1070 = vmatprep.subr.bf16.mxu0 %v1069_v20  ;;  %v1079_v35 = vpack.c.bf16 %v389_v34, %v386_v33  ;;  %v1081_v38 = vpack.c.bf16 %v396_v37, %v393_v36  ;;  %v392_v39 = vld [vmem:[#allocation8 + $0xc0] sm:$0xff]  ;;  %v395_v40 = vld [vmem:[#allocation8 + $0xd8] sm:$0xff]  ;;  %v402_v43 = vld [vmem:[#allocation8 + $0x110] sm:$0xff] }
  0x53   :  { %v1083_v41 = vpack.c.bf16 %v395_v40, %v392_v39  ;;  %v399_v42 = vld [vmem:[#allocation8 + $0xf8] sm:$0xff]  ;;  %v398_v45 = vld [vmem:[#allocation8 + $0xf0] sm:$0xff]  ;;  %v401_v46 = vld [vmem:[#allocation8 + $0x108] sm:$0xff] }
  0x54   :  { %1021 = vmatmul.mubr.msk.f32.vlgmr.msra.gmra.mrb[2].mxu1 %vm96_vm0, %v72_v9  ;;  %1072 = vmatpush1.bf16.msra.mxu0 %v1071_v23  ;;  %v1085_v44 = vpack.c.bf16 %v402_v43, %v399_v42  ;;  %v1087_v47 = vpack.c.bf16 %v401_v46, %v398_v45  ;;  %v405_v48 = vld [vmem:[#allocation8 + $0x128] sm:$0xff]  ;;  %v408_v49 = vld [vmem:[#allocation8 + $0x140] sm:$0xff]  ;;  %v407_v52 = vld [vmem:[#allocation8 + $0x138] sm:$0xff] }
  0x55   :  { %1074 = vmatprep.subr.bf16.mxu0 %v1073_v26  ;;  %v1089_v50 = vpack.c.bf16 %v408_v49, %v405_v48  ;;  %v404_v51 = vld [vmem:[#allocation8 + $0x120] sm:$0xff]  ;;  %v411_v54 = vld [vmem:[#allocation8 + $0x158] sm:$0xff]  ;;  %v414_v55 = vld [vmem:[#allocation8 + $0x170] sm:$0xff] }
  0x56   :  { %v1091_v53 = vpack.c.bf16 %v407_v52, %v404_v51  ;;  %v1093_v56 = vpack.c.bf16 %v414_v55, %v411_v54  ;;  %v410_v57 = vld [vmem:[#allocation8 + $0x150] sm:$0xff]  ;;  %v413_v58 = vld [vmem:[#allocation8 + $0x168] sm:$0xff]  ;;  %v420_v61 = vld [vmem:[#allocation8 + $0x1a0] sm:$0xff] }
  0x57   :  { %v1095_v59 = vpack.c.bf16 %v413_v58, %v410_v57  ;;  %v417_v60 = vld [vmem:[#allocation8 + $0x188] sm:$0xff]  ;;  %v418_v62 = vld [vmem:[#allocation8 + $0x190] sm:$0xff]  ;;  %v416_v2 = vld [vmem:[#allocation8 + $0x180] sm:$0xff] }
  0x58   :  { %1076 = vmatpush1.bf16.msra.mxu0 %v1075_v29  ;;  %v1097_v63 = vpack.c.bf16 %v420_v61, %v417_v60  ;;  %v421_v1 = vld [vmem:[#allocation8 + $0x1a8] sm:$0xff]  ;;  %v419_v3 = vld [vmem:[#allocation8 + $0x198] sm:$0xff]  ;;  %v370_v6 = vld [vmem:[#allocation8 + $0x10] sm:$0xff] }
  0x59   :  { %1078 = vmatprep.subr.bf16.mxu0 %v1077_v32  ;;  %v1161_v4 = vpack.c.bf16 %v421_v1, %v418_v62  ;;  %v1099_v5 = vpack.c.bf16 %v419_v3, %v416_v2  ;;  %v373_v7 = vld [vmem:[#allocation8 + $0x28] sm:$0xff]  ;;  %v423_v9 = vld [vmem:[#allocation8 + $0x1b8] sm:$0xff]  ;;  %v426_v10 = vld [vmem:[#allocation8 + $0x1d0] sm:$0xff] }
  0x5a   :  { %v1163_v8 = vpack.c.bf16 %v373_v7, %v370_v6  ;;  %v424_v12 = vld [vmem:[#allocation8 + $0x1c0] sm:$0xff]  ;;  %v1101_v13 = vpack.c.bf16 %v426_v10, %v423_v9  ;;  %v427_v14 = vld [vmem:[#allocation8 + $0x1d8] sm:$0xff]  ;;  %v422_v15 = vld [vmem:[#allocation8 + $0x1b0] sm:$0xff] }
  0x5b   :  { %1162 = vmatprep.subr.bf16.mxu1 %v1161_v4  ;;  %v425_v16 = vld [vmem:[#allocation8 + $0x1c8] sm:$0xff]  ;;  %v1165_v17 = vpack.c.bf16 %v427_v14, %v424_v12  ;;  %v376_v19 = vld [vmem:[#allocation8 + $0x40] sm:$0xff]  ;;  %v379_v20 = vld [vmem:[#allocation8 + $0x58] sm:$0xff] }
  0x5c   :  { %1080 = vmatpush1.bf16.msra.mxu0 %v1079_v35  ;;  %1164 = vmatpush3.bf16.msra.mxu1 %v1163_v8  ;;  %v1103_v18 = vpack.c.bf16 %v425_v16, %v422_v15  ;;  %v1167_v21 = vpack.c.bf16 %v379_v20, %v376_v19  ;;  %v429_v22 = vld [vmem:[#allocation8 + $0x1e8] sm:$0xff]  ;;  %v432_v23 = vld [vmem:[#allocation8 + $0x200] sm:$0xff]  ;;  %v430_v24 = vld [vmem:[#allocation8 + $0x1f0] sm:$0xff] }
  0x5d   :  { %1082 = vmatprep.subr.bf16.mxu0 %v1081_v38  ;;  %1166 = vmatprep.subr.bf16.mxu1 %v1165_v17  ;;  %v1105_v25 = vpack.c.bf16 %v432_v23, %v429_v22  ;;  %v433_v26 = vld [vmem:[#allocation8 + $0x208] sm:$0xff]  ;;  %v428_v27 = vld [vmem:[#allocation8 + $0x1e0] sm:$0xff]  ;;  %v431_v28 = vld [vmem:[#allocation8 + $0x1f8] sm:$0xff] }
  0x5e   :  { %v1169_v29 = vpack.c.bf16 %v433_v26, %v430_v24  ;;  %v1107_v30 = vpack.c.bf16 %v431_v28, %v428_v27  ;;  %v382_v31 = vld [vmem:[#allocation8 + $0x70] sm:$0xff]  ;;  %v385_v32 = vld [vmem:[#allocation8 + $0x88] sm:$0xff]  ;;  %v435_v34 = vld [vmem:[#allocation8 + $0x218] sm:$0xff] }
  0x5f   :  { %v1171_v33 = vpack.c.bf16 %v385_v32, %v382_v31  ;;  %v438_v35 = vld [vmem:[#allocation8 + $0x230] sm:$0xff]  ;;  %v436_v36 = vld [vmem:[#allocation8 + $0x220] sm:$0xff]  ;;  %v439_v38 = vld [vmem:[#allocation8 + $0x238] sm:$0xff] }
  0x60   :  { %1084 = vmatpush1.bf16.msra.mxu0 %v1083_v41  ;;  %1168 = vmatpush3.bf16.msra.mxu1 %v1167_v21  ;;  %v1109_v37 = vpack.c.bf16 %v438_v35, %v435_v34  ;;  %v434_v39 = vld [vmem:[#allocation8 + $0x210] sm:$0xff]  ;;  %v437_v40 = vld [vmem:[#allocation8 + $0x228] sm:$0xff]  ;;  %v1173_v41 = vpack.c.bf16 %v439_v38, %v436_v36  ;;  %v388_v43 = vld [vmem:[#allocation8 + $0xa0] sm:$0xff]  ;;  %v81_v35 = vlaneseq }
  0x61   :  { %1086 = vmatprep.subr.bf16.mxu0 %v1085_v44  ;;  %1170 = vmatprep.subr.bf16.mxu1 %v1169_v29  ;;  %v1111_v42 = vpack.c.bf16 %v437_v40, %v434_v39  ;;  %v391_v44 = vld [vmem:[#allocation8 + $0xb8] sm:$0xff]  ;;  %v441_v45 = vld [vmem:[#allocation8 + $0x248] sm:$0xff]  ;;  %v442_v48 = vld [vmem:[#allocation8 + $0x250] sm:$0xff] }
  0x62   :  { %v1175_v46 = vpack.c.bf16 %v391_v44, %v388_v43  ;;  %v445_v49 = vld [vmem:[#allocation8 + $0x268] sm:$0xff]  ;;  %v440_v52 = vld [vmem:[#allocation8 + $0x240] sm:$0xff]  ;;  %v394_v54 = vld [vmem:[#allocation8 + $0xd0] sm:$0xff]  ;;  %v82_v36 = vshrl.u32 %v81_v35, 7 }
  0x63   :  { %v1177_v51 = vpack.c.bf16 %v445_v49, %v442_v48  ;;  %v447_v57 = vld [vmem:[#allocation8 + $0x278] sm:$0xff]  ;;  %v450_v58 = vld [vmem:[#allocation8 + $0x290] sm:$0xff]  ;;  %v448_v61 = vld [vmem:[#allocation8 + $0x280] sm:$0xff] }
  0x64   :  { %1088 = vmatpush1.bf16.msra.mxu0 %v1087_v47  ;;  %1172 = vmatpush3.bf16.msra.mxu1 %v1171_v33  ;;  %v444_v47 = vld [vmem:[#allocation8 + $0x260] sm:$0xff]  ;;  %v1117_v60 = vpack.c.bf16 %v450_v58, %v447_v57  ;;  %v451_v62 = vld [vmem:[#allocation8 + $0x298] sm:$0xff]  ;;  %v449_v2 = vld [vmem:[#allocation8 + $0x288] sm:$0xff]  ;;  %v1474_v39 = vsub.s32 1, %v82_v36 }
  0x65   :  { %1090 = vmatprep.subr.bf16.mxu0 %v1089_v50  ;;  %1174 = vmatprep.subr.bf16.mxu1 %v1173_v41  ;;  %v1113_v50 = vpack.c.bf16 %v444_v47, %v441_v45  ;;  %v1181_v1 = vpack.c.bf16 %v451_v62, %v448_v61  ;;  %v400_v3 = vld [vmem:[#allocation8 + $0x100] sm:$0xff]  ;;  %v403_v4 = vld [vmem:[#allocation8 + $0x118] sm:$0xff]  ;;  %v454_v7 = vld [vmem:[#allocation8 + $0x2b0] sm:$0xff]  ;;  %v1477_v41 = vsub.s32 2, %v82_v36 }
  0x66   :  { %v456_v6 = vld [vmem:[#allocation8 + $0x2c0] sm:$0xff]  ;;  %v457_v9 = vld [vmem:[#allocation8 + $0x2c8] sm:$0xff]  ;;  %v1183_v10 = vpack.c.bf16 %v403_v4, %v400_v3  ;;  %v455_v14 = vld [vmem:[#allocation8 + $0x2b8] sm:$0xff] }
  0x67   :  { %v406_v15 = vld [vmem:[#allocation8 + $0x130] sm:$0xff]  ;;  %v1185_v16 = vpack.c.bf16 %v457_v9, %v454_v7  ;;  %v409_v17 = vld [vmem:[#allocation8 + $0x148] sm:$0xff]  ;;  %v460_v20 = vld [vmem:[#allocation8 + $0x2e0] sm:$0xff] }
  0x68   :  { %1092 = vmatpush1.bf16.msra.mxu0 %v1091_v53  ;;  %v443_v53 = vld [vmem:[#allocation8 + $0x258] sm:$0xff]  ;;  %1176 = vmatpush3.bf16.msra.mxu1 %v1175_v46  ;;  %v462_v19 = vld [vmem:[#allocation8 + $0x2f0] sm:$0xff]  ;;  %v1187_v23 = vpack.c.bf16 %v409_v17, %v406_v15  ;;  %v461_v26 = vld [vmem:[#allocation8 + $0x2e8] sm:$0xff] }
  0x69   :  { %1094 = vmatprep.subr.bf16.mxu0 %v1093_v56  ;;  %v1115_v55 = vpack.c.bf16 %v443_v53, %v440_v52  ;;  %v397_v56 = vld [vmem:[#allocation8 + $0xe8] sm:$0xff]  ;;  %1178 = vmatprep.subr.bf16.mxu1 %v1177_v51  ;;  %v463_v21 = vld [vmem:[#allocation8 + $0x2f8] sm:$0xff]  ;;  %v412_v28 = vld [vmem:[#allocation8 + $0x160] sm:$0xff] }
  0x6a   :  { %v1189_v27 = vpack.c.bf16 %v463_v21, %v460_v20  ;;  %v415_v29 = vld [vmem:[#allocation8 + $0x178] sm:$0xff]  ;;  %v465_v32 = vld [vmem:[#allocation8 + $0x308] sm:$0xff]  ;;  %v468_v33 = vld [vmem:[#allocation8 + $0x320] sm:$0xff] }
  0x6b   :  { %v1191_v31 = vpack.c.bf16 %v415_v29, %v412_v28  ;;  %v1129_v34 = vpack.c.bf16 %v468_v33, %v465_v32  ;;  %v79_v38 = vld [vmem:[#allocation7] ss:$4 sm:$0x7] }
  0x6c   :  { %1096 = vmatpush1.bf16.msra.mxu0 %v1095_v59  ;;  %v1179_v59 = vpack.c.bf16 %v397_v56, %v394_v54  ;;  %v92_v46 = vrot.slane %v79_v38, %v1477_v41 }
  0x6d   :  { %1098 = vmatprep.subr.bf16.mxu0 %v1097_v63  ;;  %v446_v63 = vld [vmem:[#allocation8 + $0x270] sm:$0xff] }
  0x6e   :  { %v1119_v8 = vpack.c.bf16 %v449_v2, %v446_v63  ;;  %1180 = vmatpush3.bf16.msra.mxu1 %v1179_v59 }
  0x6f   :  { %1182 = vmatprep.subr.bf16.mxu1 %v1181_v1 }
  0x70   :  { %1100 = vmatpush1.bf16.msra.mxu0 %v1099_v5  ;;  %v453_v5 = vld [vmem:[#allocation8 + $0x2a8] sm:$0xff] }
  0x71   :  { %1102 = vmatprep.subr.bf16.mxu0 %v1101_v13  ;;  %v1121_v12 = vpack.c.bf16 %v456_v6, %v453_v5  ;;  %v452_v13 = vld [vmem:[#allocation8 + $0x2a0] sm:$0xff] }
  0x72   :  { %v1123_v22 = vpack.c.bf16 %v455_v14, %v452_v13  ;;  %1184 = vmatpush3.bf16.msra.mxu1 %v1183_v10 }
  0x73   :  { %1186 = vmatprep.subr.bf16.mxu1 %v1185_v16 }
  0x74   :  { %1104 = vmatpush1.bf16.msra.mxu0 %v1103_v18  ;;  %v459_v18 = vld [vmem:[#allocation8 + $0x2d8] sm:$0xff] }
  0x75   :  { %1106 = vmatprep.subr.bf16.mxu0 %v1105_v25  ;;  %v1125_v24 = vpack.c.bf16 %v462_v19, %v459_v18  ;;  %v458_v25 = vld [vmem:[#allocation8 + $0x2d0] sm:$0xff] }
  0x76   :  { %1188 = vmatpush3.bf16.msra.mxu1 %v1187_v23 }
  0x77   :  { %1190 = vmatprep.subr.bf16.mxu1 %v1189_v27 }
  0x78   :  { %1108 = vmatpush1.bf16.msra.mxu0 %v1107_v30  ;;  %v1127_v30 = vpack.c.bf16 %v461_v26, %v458_v25 }
  0x79   :  { %1110 = vmatprep.subr.bf16.mxu0 %v1109_v37  ;;  %v1472_v37 = vsub.s32 0, %v82_v36 }
  0x7a   :  { %1192 = vmatpush3.bf16.msra.mxu1 %v1191_v31 }
  0x7b   :  { %1193 = vmatprep.subr.bf16.mxu1 %v1380_v11  ;;  %v84_v40 = vrot.slane %v79_v38, %v1472_v37 }
  0x7c   :  { %1112 = vmatpush1.bf16.msra.mxu0 %v1111_v42  ;;  %v88_v42 = vrot.slane %v79_v38, %v1474_v39 }
  0x7d   :  { %1114 = vmatprep.subr.bf16.mxu0 %v1113_v50 }
  0x80   :  { %1116 = vmatpush1.bf16.msra.mxu0 %v1115_v55 }
  0x81   :  { %1118 = vmatprep.subr.bf16.mxu0 %v1117_v60 }
  0x84   :  { %1120 = vmatpush1.bf16.msra.mxu0 %v1119_v8 }
  0x85   :  { %1122 = vmatprep.subr.bf16.mxu0 %v1121_v12 }
  0x88   :  { %1124 = vmatpush1.bf16.msra.mxu0 %v1123_v22 }
  0x89   :  { %1126 = vmatprep.subr.bf16.mxu0 %v1125_v24 }
  0x8c   :  { %1128 = vmatpush1.bf16.msra.mxu0 %v1127_v30 }
  0x8d   :  { %1130 = vmatprep.subr.bf16.mxu0 %v1129_v34 }
 0x123   :  { %v166_v43 = vpop.f32.mrb[0].mxu1 }
 0x124   :  { %v167_v44 = vadd.f32 %v166_v43, %v84_v40  ;;  %v168_v45 = vpop.f32.mrb[1].mxu1  ;;  %v244_v43 = vld [vmem:[#allocation7 + $0x2] ss:$4 sm:$0x7] }
 0x125   :  { %v169_v47 = vadd.f32 %v168_v45, %v88_v42  ;;  %v242_v42 = vld [vmem:[#allocation7 + $0x1] ss:$4 sm:$0x7] }
 0x126   :  { %v245_v48 = vrot.slane %v167_v44, 4  ;;  %v307_v45 = vrot.slane %v242_v42, %v1472_v37 }
 0x127   :  { %v251_v49 = vrot.slane %v169_v47, 4  ;;  %v237_v50 = vpop.f32.mrb[2].mxu1 }
 0x128   :  { %v246_v51 = vadd.f32 %v245_v48, %v167_v44  ;;  %v238_v52 = vadd.f32 %v237_v50, %v92_v46  ;;  %v1022_v53 = vpop.f32.mrb[3].mxu1  ;;  %v326_v50 = vrot.slane %v244_v43, %v1472_v37 }
 0x129   :  { %v252_v54 = vadd.f32 %v251_v49, %v169_v47 }
 0x12a   :  { %v247_v55 = vrot.slane %v246_v51, 2  ;;  %v257_v56 = vrot.slane %v238_v52, 4 }
 0x12b   :  { %v253_v57 = vrot.slane %v252_v54, 2 }
 0x12c   :  { %v248_v58 = vadd.f32 %v247_v55, %v246_v51  ;;  %v258_v59 = vadd.f32 %v257_v56, %v238_v52 }
 0x12d   :  { %v254_v60 = vadd.f32 %v253_v57, %v252_v54 }
 0x12e   :  { %v249_v61 = vrot.slane %v248_v58, 1  ;;  %v259_v62 = vrot.slane %v258_v59, 2 }
 0x12f   :  { %v255_v63 = vrot.slane %v254_v60, 1 }
 0x130   :  { %v250_v1 = vadd.f32 %v249_v61, %v248_v58  ;;  %v260_v2 = vadd.f32 %v259_v62, %v258_v59 }
 0x131   :  { %v256_v3 = vadd.f32 %v255_v63, %v254_v60 }
 0x132   :  { %v264_v4 = vmul.f32 0.125, %v250_v1  ;;  %v261_v5 = vrot.slane %v260_v2, 1 }
 0x133   :  { %v265_v6 = vmul.f32 0.125, %v256_v3 }
 0x134   :  { %v267_v7 = vsub.f32 %v167_v44, %v264_v4  ;;  %v262_v8 = vadd.f32 %v261_v5, %v260_v2  ;;  %v315_v4 = vrot.slane %v242_v42, %v1477_v41 }
 0x135   :  { %v268_v9 = vsub.f32 %v169_v47, %v265_v6  ;;  %v311_v47 = vrot.slane %v242_v42, %v1474_v39 }
 0x136   :  { %v270_v10 = vmul.f32 %v267_v7, %v267_v7  ;;  %v266_v12 = vmul.f32 0.125, %v262_v8  ;;  %v334_v8 = vrot.slane %v244_v43, %v1477_v41 }
 0x137   :  { %v271_v13 = vmul.f32 %v268_v9, %v268_v9 }
 0x138   :  { %v273_v14 = vrot.slane %v270_v10, 4  ;;  %v269_v15 = vsub.f32 %v238_v52, %v266_v12  ;;  %v330_v52 = vrot.slane %v244_v43, %v1474_v39  ;;  %v464_v12 = vld [vmem:[#allocation8 + $0x300] sm:$0xff] }
 0x139   :  { %v279_v16 = vrot.slane %v271_v13, 4 }
 0x13a   :  { %v274_v17 = vadd.f32 %v273_v14, %v270_v10  ;;  %v272_v18 = vmul.f32 %v269_v15, %v269_v15 }
 0x13b   :  { %v280_v19 = vadd.f32 %v279_v16, %v271_v13 }
 0x13c   :  { %v275_v20 = vrot.slane %v274_v17, 2  ;;  %v285_v21 = vrot.slane %v272_v18, 4 }
 0x13d   :  { %v281_v22 = vrot.slane %v280_v19, 2 }
 0x13e   :  { %v276_v23 = vadd.f32 %v275_v20, %v274_v17  ;;  %v286_v24 = vadd.f32 %v285_v21, %v272_v18  ;;  %v467_v17 = vld [vmem:[#allocation8 + $0x318] sm:$0xff]  ;;  %v466_v18 = vld [vmem:[#allocation8 + $0x310] sm:$0xff] }
 0x13f   :  { %v282_v25 = vadd.f32 %v281_v22, %v280_v19  ;;  %v471_v21 = vld [vmem:[#allocation8 + $0x338] sm:$0xff]  ;;  %v474_v22 = vld [vmem:[#allocation8 + $0x350] sm:$0xff] }
 0x140   :  { %v277_v26 = vrot.slane %v276_v23, 1  ;;  %v287_v27 = vrot.slane %v286_v24, 2 }
 0x141   :  { %v283_v28 = vrot.slane %v282_v25, 1 }
 0x142   :  { %v278_v29 = vadd.f32 %v277_v26, %v276_v23  ;;  %v288_v30 = vadd.f32 %v287_v27, %v286_v24  ;;  %v470_v27 = vld [vmem:[#allocation8 + $0x330] sm:$0xff] }
 0x143   :  { %v284_v31 = vadd.f32 %v283_v28, %v282_v25  ;;  %v1131_v25 = vpack.c.bf16 %v467_v17, %v464_v12  ;;  %v496_v12 = vld [vmem:[#allocation8 + $0x400] sm:$0xff] }
 0x144   :  { %v291_v32 = vmul.f32 0.125, %v278_v29  ;;  %v289_v33 = vrot.slane %v288_v30, 1 }
 0x145   :  { %v292_v34 = vmul.f32 0.125, %v284_v31  ;;  %v473_v31 = vld [vmem:[#allocation8 + $0x348] sm:$0xff] }
 0x146   :  { %v294_v35 = vadd.f32 1e-05, %v291_v32  ;;  %v290_v38 = vadd.f32 %v289_v33, %v288_v30  ;;  %v1133_v30 = vpack.c.bf16 %v474_v22, %v471_v21  ;;  %v472_v32 = vld [vmem:[#allocation8 + $0x340] sm:$0xff]  ;;  %v475_v33 = vld [vmem:[#allocation8 + $0x358] sm:$0xff]  ;;  %v502_v21 = vld [vmem:[#allocation8 + $0x430] sm:$0xff] }
 0x147   :  { %v295_v36 = vadd.f32 1e-05, %v292_v34  ;;  %v477_v34 = vld [vmem:[#allocation8 + $0x368] sm:$0xff] }
 0x148   :  { %1231 = vrsqrt.f32 %v294_v35  ;;  %v293_v40 = vmul.f32 0.125, %v290_v38  ;;  %v480_v35 = vld [vmem:[#allocation8 + $0x380] sm:$0xff]  ;;  %v1197_v38 = vpack.c.bf16 %v475_v33, %v472_v32  ;;  %v505_v22 = vld [vmem:[#allocation8 + $0x448] sm:$0xff] }
 0x149   :  { %1233 = vrsqrt.f32 %v295_v36  ;;  %v1135_v36 = vpack.c.bf16 %v473_v31, %v470_v27  ;;  %v1137_v43 = vpack.c.bf16 %v480_v35, %v477_v34  ;;  %v506_v27 = vld [vmem:[#allocation8 + $0x450] sm:$0xff]  ;;  %v511_v31 = vld [vmem:[#allocation8 + $0x478] sm:$0xff] }
 0x14a   :  { %v296_v44 = vadd.f32 1e-05, %v293_v40  ;;  %v476_v40 = vld [vmem:[#allocation8 + $0x360] sm:$0xff] }
 0x14c   :  { %1235 = vrsqrt.f32 %v296_v44  ;;  %v479_v44 = vld [vmem:[#allocation8 + $0x378] sm:$0xff] }
 0x152   :  { %v1232_v46 = vpop.eup %1231 }
 0x153   :  { %v1234_v48 = vpop.eup %1233  ;;  %v300_v49 = vmul.f32 %v1232_v46, %v267_v7  ;;  %v481_v46 = vld [vmem:[#allocation8 + $0x388] sm:$0xff] }
 0x154   :  { %v301_v51 = vmul.f32 %v1234_v48, %v268_v9  ;;  %v486_v48 = vld [vmem:[#allocation8 + $0x3b0] sm:$0xff] }
 0x155   :  { %v319_v53 = vmul.f32 %v307_v45, %v300_v49  ;;  %v478_v45 = vld [vmem:[#allocation8 + $0x370] sm:$0xff]  ;;  %v1139_v49 = vpack.c.bf16 %v479_v44, %v476_v40 }
 0x156   :  { %v320_v54 = vmul.f32 %v311_v47, %v301_v51  ;;  %v1236_v62 = vpop.eup %1235  ;;  %v483_v47 = vld [vmem:[#allocation8 + $0x398] sm:$0xff]  ;;  %v482_v51 = vld [vmem:[#allocation8 + $0x390] sm:$0xff] }
 0x157   :  { %v338_v55 = vadd.f32 %v326_v50, %v319_v53  ;;  %v302_v3 = vmul.f32 %v1236_v62, %v269_v15  ;;  %v469_v15 = vld [vmem:[#allocation8 + $0x328] sm:$0xff]  ;;  %v1200_v50 = vpack.c.bf16 %v481_v46, %v478_v45  ;;  %v1141_v53 = vpack.c.bf16 %v486_v48, %v483_v47 }
 0x158   :  { %v339_v56 = vadd.f32 %v330_v52, %v320_v54  ;;  %v1194_v26 = vpack.c.bf16 %v469_v15, %v466_v18  ;;  %v485_v54 = vld [vmem:[#allocation8 + $0x3a8] sm:$0xff]  ;;  %v500_v15 = vld [vmem:[#allocation8 + $0x420] sm:$0xff] }
 0x159   :  { %v344_v57 = vmul.f32 0.044715, %v338_v55  ;;  %v321_v7 = vmul.f32 %v315_v4, %v302_v3  ;;  %v341_v23 = vmul.f32 0.5, %v338_v55  ;;  %v495_v3 = vld [vmem:[#allocation8 + $0x3f8] sm:$0xff]  ;;  %v498_v4 = vld [vmem:[#allocation8 + $0x410] sm:$0xff] }
 0x15a   :  { %v345_v58 = vmul.f32 0.044715, %v339_v56  ;;  %v342_v19 = vmul.f32 0.5, %v339_v56  ;;  %v512_v44 = vld [vmem:[%s1538_s4] ss:$4 sm:$0x7] }
 0x15b   :  { %v347_v59 = vmul.f32 %v344_v57, %v338_v55  ;;  %v1487_v9 = vadd.f32 %v334_v8, %v321_v7  ;;  %v489_v57 = vld [vmem:[#allocation8 + $0x3c8] sm:$0xff]  ;;  %v494_v7 = vld [vmem:[#allocation8 + $0x3f0] sm:$0xff]  ;;  %v1149_v8 = vpack.c.bf16 %v498_v4, %v495_v3  ;;  %v525_v45 = vrot.slane %v512_v44, %v1477_v41 }
 0x15c   :  { %v348_v60 = vmul.f32 %v345_v58, %v339_v56  ;;  %v492_v58 = vld [vmem:[#allocation8 + $0x3e0] sm:$0xff]  ;;  %v517_v46 = vrot.slane %v512_v44, %v1472_v37 }
 0x15d   :  { %v350_v61 = vmul.f32 %v347_v59, %v338_v55  ;;  %v346_v13 = vmul.f32 0.044715, %v1487_v9  ;;  %v1143_v59 = vpack.c.bf16 %v485_v54, %v482_v51  ;;  %v1145_v62 = vpack.c.bf16 %v492_v58, %v489_v57 }
 0x15e   :  { %v351_v63 = vmul.f32 %v348_v60, %v339_v56  ;;  %v488_v60 = vld [vmem:[#allocation8 + $0x3c0] sm:$0xff] }
 0x15f   :  { %v353_v1 = vadd.f32 %v350_v61, %v338_v55  ;;  %v349_v28 = vmul.f32 %v346_v13, %v1487_v9  ;;  %v484_v55 = vld [vmem:[#allocation8 + $0x3a0] sm:$0xff]  ;;  %v499_v13 = vld [vmem:[#allocation8 + $0x418] sm:$0xff] }
 0x160   :  { %v354_v2 = vadd.f32 %v351_v63, %v339_v56  ;;  %v487_v56 = vld [vmem:[#allocation8 + $0x3b8] sm:$0xff]  ;;  %v1209_v18 = vpack.c.bf16 %v499_v13, %v496_v12 }
 0x161   :  { %v356_v5 = vmul.f32 0.7978846, %v353_v1  ;;  %v352_v42 = vmul.f32 %v349_v28, %v1487_v9  ;;  %v491_v63 = vld [vmem:[#allocation8 + $0x3d8] sm:$0xff]  ;;  %v490_v1 = vld [vmem:[#allocation8 + $0x3d0] sm:$0xff] }
 0x162   :  { %v357_v6 = vmul.f32 0.7978846, %v354_v2  ;;  %v493_v2 = vld [vmem:[#allocation8 + $0x3e8] sm:$0xff] }
 0x163   :  { %1237 = vtanh.f32 %v356_v5  ;;  %v355_v52 = vadd.f32 %v352_v42, %v1487_v9  ;;  %v1147_v5 = vpack.c.bf16 %v491_v63, %v488_v60 }
 0x164   :  { %1239 = vtanh.f32 %v357_v6  ;;  %v1206_v6 = vpack.c.bf16 %v493_v2, %v490_v1 }
 0x165   :  { %v358_v61 = vmul.f32 0.7978846, %v355_v52 }
 0x167   :  { %1241 = vtanh.f32 %v358_v61 }
 0x16d   :  { %v1238_v10 = vpop.eup %1237 }
 0x16e   :  { %v1240_v14 = vpop.eup %1239  ;;  %v362_v16 = vadd.f32 1.0, %v1238_v10  ;;  %v497_v10 = vld [vmem:[#allocation8 + $0x408] sm:$0xff] }
 0x16f   :  { %v363_v20 = vadd.f32 1.0, %v1240_v14  ;;  %v501_v14 = vld [vmem:[#allocation8 + $0x428] sm:$0xff]  ;;  %v1151_v17 = vpack.c.bf16 %v497_v10, %v494_v7 }
 0x170   :  { %v365_v29 = vmul.f32 %v362_v16, %v341_v23  ;;  %v504_v16 = vld [vmem:[#allocation8 + $0x440] sm:$0xff]  ;;  %v507_v23 = vld [vmem:[#allocation8 + $0x458] sm:$0xff] }
 0x171   :  { %v366_v24 = vmul.f32 %v363_v20, %v342_v19  ;;  %v1153_v19 = vpack.c.bf16 %v504_v16, %v501_v14  ;;  %v503_v20 = vld [vmem:[#allocation8 + $0x438] sm:$0xff]  ;;  %v1242_v32 = vpop.eup %1241 }
 0x172   :  { %v364_v35 = vadd.f32 1.0, %v1242_v32 }
 0x173   :  { %593 = vmatprep.mubr.f32.mxu0 %v366_v24  ;;  %735 = vmatprep.mubr.f32.mxu1 %v366_v24  ;;  %v510_v24 = vld [vmem:[#allocation8 + $0x470] sm:$0xff] }
 0x174   :  { %594 = vmatmul.mubr.f32.vlgmr.msra.gmra.mrb[0].mxu0 %v365_v29  ;;  %736 = vmatmul.mubr.f32.vlgmr.msra.gmra.mrb[4].mxu1 %v365_v29  ;;  %v1157_v28 = vpack.c.bf16 %v510_v24, %v507_v23  ;;  %v509_v29 = vld [vmem:[#allocation8 + $0x468] sm:$0xff] }
 0x175   :  { %1132 = vmatpush1.bf16.msra.mxu0 %v1131_v25  ;;  %1195 = vmatpush3.bf16.msra.mxu1 %v1194_v26  ;;  %v1155_v25 = vpack.c.bf16 %v503_v20, %v500_v15  ;;  %v1212_v26 = vpack.c.bf16 %v505_v22, %v502_v21  ;;  %v1159_v33 = vpack.c.bf16 %v509_v29, %v506_v27 }
 0x176   :  { %1134 = vmatprep.subr.bf16.mxu0 %v1133_v30  ;;  %1196 = vmatprep.subr.bf16.mxu1 %v1380_v11  ;;  %v508_v30 = vld [vmem:[#allocation8 + $0x460] sm:$0xff] }
 0x177   :  { %664 = vmatprep.mubr.f32.mxu0 %v1379_v0  ;;  %1055 = vmatprep.mubr.msk.f32.mxu1 %vm1381_vm1, %v1379_v0  ;;  %v1203_v0 = vpack.c.bf16 %v487_v56, %v484_v55  ;;  %v1215_v34 = vpack.c.bf16 %v511_v31, %v508_v30 }
 0x179   :  { %1136 = vmatpush1.bf16.msra.mxu0 %v1135_v36  ;;  %1198 = vmatpush3.bf16.msra.mxu1 %v1197_v38  ;;  %v343_v36 = vmul.f32 0.5, %v1487_v9 }
 0x17a   :  { %1138 = vmatprep.subr.bf16.mxu0 %v1137_v43  ;;  %1199 = vmatprep.subr.bf16.mxu1 %v1380_v11 }
 0x17b   :  { %v367_v38 = vmul.f32 %v364_v35, %v343_v36 }
 0x17d   :  { %1140 = vmatpush1.bf16.msra.mxu0 %v1139_v49  ;;  %1201 = vmatpush3.bf16.msra.mxu1 %v1200_v50 }
 0x17e   :  { %1142 = vmatprep.subr.bf16.mxu0 %v1141_v53  ;;  %1202 = vmatprep.subr.bf16.mxu1 %v1380_v11 }
 0x181   :  { %1144 = vmatpush1.bf16.msra.mxu0 %v1143_v59  ;;  %1204 = vmatpush3.bf16.msra.mxu1 %v1203_v0 }
 0x182   :  { %1146 = vmatprep.subr.bf16.mxu0 %v1145_v62  ;;  %1205 = vmatprep.subr.bf16.mxu1 %v1380_v11 }
 0x185   :  { %1148 = vmatpush1.bf16.msra.mxu0 %v1147_v5  ;;  %1207 = vmatpush3.bf16.msra.mxu1 %v1206_v6 }
 0x186   :  { %1150 = vmatprep.subr.bf16.mxu0 %v1149_v8  ;;  %1208 = vmatprep.subr.bf16.mxu1 %v1380_v11 }
 0x189   :  { %1152 = vmatpush1.bf16.msra.mxu0 %v1151_v17  ;;  %1210 = vmatpush3.bf16.msra.mxu1 %v1209_v18 }
 0x18a   :  { %1154 = vmatprep.subr.bf16.mxu0 %v1153_v19  ;;  %1211 = vmatprep.subr.bf16.mxu1 %v1380_v11 }
 0x18d   :  { %1156 = vmatpush1.bf16.msra.mxu0 %v1155_v25  ;;  %1213 = vmatpush3.bf16.msra.mxu1 %v1212_v26 }
 0x18e   :  { %1158 = vmatprep.subr.bf16.mxu0 %v1157_v28  ;;  %1214 = vmatprep.subr.bf16.mxu1 %v1380_v11  ;;  %v521_v11 = vrot.slane %v512_v44, %v1474_v39 }
 0x191   :  { %1160 = vmatpush1.bf16.msra.mxu0 %v1159_v33  ;;  %1216 = vmatpush3.bf16.msra.mxu1 %v1215_v34 }
 0x194   :  { %665 = vmatmul.mubr.f32.vlgmr.msra.gmra.mrb[0].mxu0 %v367_v38  ;;  %1056 = vmatmul.mubr.f32.vlgmr.msra.gmra.mrb[6].mxu1 %v367_v38 }
 0x247   :  { %v996_v40 = vpop.f32.mrb[4].mxu1 }
 0x248   :  { %v997_v42 = vpop.f32.mrb[5].mxu1 }
 0x249   :  { %v998_v43 = vadd.f32 %v997_v42, %v996_v40 }
 0x24b   :  { %v738_v47 = vadd.f32 %v998_v43, %v525_v45 }
 0x267   :  { %v666_v9 = vpop.f32.mrb[0].mxu0  ;;  %v807_v48 = vpop.f32.mrb[6].mxu1 }
 0x268   :  { %v1217_v49 = vadd.f32 %v666_v9, %v517_v46  ;;  %v808_v50 = vadd.f32 %v807_v48, %v738_v47  ;;  %v668_v51 = vpop.f32.mrb[1].mxu0  ;;  %v1057_v52 = vpop.f32.mrb[7].mxu1  ;;  %v959_v46 = vld [vmem:[%s1538_s4 + $0x1] ss:$4 sm:$0x7] }
 0x269   :  { %v1218_v53 = vadd.f32 %v668_v51, %v521_v11  ;;  %v960_v11 = vld [vmem:[%s1538_s4 + $0x2] ss:$4 sm:$0x7]  ;;  %v876_v47 = vrot.slane %v959_v46, %v1472_v37  ;;  %v884_v48 = vrot.slane %v959_v46, %v1477_v41  ;;  %v880_v52 = vrot.slane %v959_v46, %v1474_v39  ;;  %s1382_s4 = smov [#allocation10]  }
 0x26a   :  { %v815_v54 = vrot.slane %v1217_v49, 4  ;;  %v827_v55 = vrot.slane %v808_v50, 4  ;;  %v895_v51 = vrot.slane %v960_v11, %v1472_v37  ;;  %s946_s19 = sshll.u32 %s1382_s4, 4  ;;  %s947_s19 = int_to_ptr.vmem [resolvable:$true] %s946_s19 }
 0x26b   :  { %v821_v56 = vrot.slane %v1218_v53, 4  ;;  %s1343_s20 = scalar_lea.vmem %s947_s19, 384  ;;  %p1348_p5 = scmp.lt.s32.totalorder %s947_s19, %s947_s19 }
 0x26c   :  { %v816_v57 = vadd.f32 %v1217_v49, %v815_v54  ;;  %v828_v58 = vadd.f32 %v827_v55, %v808_v50  ;;  %v903_v55 = vrot.slane %v960_v11, %v1477_v41  ;;  %p1344_p4 = scmp.ne.s32.totalorder %s947_s19, %s1343_s20  ;;  %p1349_p6 = scmp.lt.s32.totalorder %s1343_s20, %s1343_s20 }
 0x26d   :  { %v822_v59 = vadd.f32 %v1218_v53, %v821_v56 }
 0x26e   :  { %v817_v0 = vrot.slane %v816_v57, 2  ;;  %v829_v60 = vrot.slane %v828_v58, 2  ;;  %p1350_p7 = por %p1349_p6, %p1348_p5 }
 0x26f   :  { %v823_v61 = vrot.slane %v822_v59, 2 }
 0x270   :  { %v818_v62 = vadd.f32 %v817_v0, %v816_v57  ;;  %v830_v63 = vadd.f32 %v829_v60, %v828_v58  ;;  %v899_v58 = vrot.slane %v960_v11, %v1474_v39  ;;  %p1351_p8 = pnand %p1350_p7, %p1344_p4 }
 0x271   :  { %v824_v1 = vadd.f32 %v823_v61, %v822_v59 }
 0x272   :  { %v819_v2 = vrot.slane %v818_v62, 1  ;;  %v831_v3 = vrot.slane %v830_v63, 1 }
 0x273   :  { %v825_v4 = vrot.slane %v824_v1, 1 }
 0x274   :  { %v820_v5 = vadd.f32 %v819_v2, %v818_v62  ;;  %v832_v6 = vadd.f32 %v831_v3, %v830_v63 }
 0x275   :  { %v826_v7 = vadd.f32 %v825_v4, %v824_v1 }
 0x276   :  { %v833_v8 = vmul.f32 0.125, %v820_v5  ;;  %v835_v10 = vmul.f32 0.125, %v832_v6 }
 0x277   :  { %v834_v12 = vmul.f32 0.125, %v826_v7 }
 0x278   :  { %v836_v13 = vsub.f32 %v1217_v49, %v833_v8  ;;  %v838_v14 = vsub.f32 %v808_v50, %v835_v10 }
 0x279   :  { %v837_v16 = vsub.f32 %v1218_v53, %v834_v12 }
 0x27a   :  { %v839_v17 = vmul.f32 %v836_v13, %v836_v13  ;;  %v841_v18 = vmul.f32 %v838_v14, %v838_v14 }
 0x27b   :  { %v840_v15 = vmul.f32 %v837_v16, %v837_v16 }
 0x27c   :  { %v842_v19 = vrot.slane %v839_v17, 4  ;;  %v854_v20 = vrot.slane %v841_v18, 4 }
 0x27d   :  { %v848_v21 = vrot.slane %v840_v15, 4 }
 0x27e   :  { %v843_v22 = vadd.f32 %v842_v19, %v839_v17  ;;  %v855_v23 = vadd.f32 %v854_v20, %v841_v18 }
 0x27f   :  { %v849_v24 = vadd.f32 %v848_v21, %v840_v15 }
 0x280   :  { %v844_v25 = vrot.slane %v843_v22, 2  ;;  %v856_v26 = vrot.slane %v855_v23, 2 }
 0x281   :  { %v850_v27 = vrot.slane %v849_v24, 2 }
 0x282   :  { %v845_v28 = vadd.f32 %v844_v25, %v843_v22  ;;  %v857_v29 = vadd.f32 %v856_v26, %v855_v23 }
 0x283   :  { %v851_v30 = vadd.f32 %v850_v27, %v849_v24 }
 0x284   :  { %v846_v31 = vrot.slane %v845_v28, 1  ;;  %v858_v32 = vrot.slane %v857_v29, 1 }
 0x285   :  { %v852_v33 = vrot.slane %v851_v30, 1 }
 0x286   :  { %v847_v34 = vadd.f32 %v846_v31, %v845_v28  ;;  %v859_v35 = vadd.f32 %v858_v32, %v857_v29 }
 0x287   :  { %v853_v36 = vadd.f32 %v852_v33, %v851_v30 }
 0x288   :  { %v860_v38 = vmul.f32 0.125, %v847_v34  ;;  %v862_v40 = vmul.f32 0.125, %v859_v35 }
 0x289   :  { %v861_v42 = vmul.f32 0.125, %v853_v36 }
 0x28a   :  { %v863_v43 = vadd.f32 1e-05, %v860_v38  ;;  %v865_v44 = vadd.f32 1e-05, %v862_v40 }
 0x28b   :  { %v864_v45 = vadd.f32 1e-05, %v861_v42 }
 0x28c   :  { %1243 = vrsqrt.f32 %v863_v43 }
 0x28d   :  { %1245 = vrsqrt.f32 %v865_v44 }
 0x28e   :  { %1247 = vrsqrt.f32 %v864_v45 }
 0x296   :  { %v1244_v9 = vpop.eup %1243 }
 0x297   :  { %v1246_v49 = vpop.eup %1245  ;;  %v869_v50 = vmul.f32 %v1244_v9, %v836_v13 }
 0x298   :  { %v1248_v53 = vpop.eup %1247  ;;  %v871_v54 = vmul.f32 %v1246_v49, %v838_v14 }
 0x299   :  { %v888_v56 = vmul.f32 %v876_v47, %v869_v50  ;;  %v870_v57 = vmul.f32 %v1248_v53, %v837_v16 }
 0x29a   :  { %v890_v59 = vmul.f32 %v884_v48, %v871_v54 }
 0x29b   :  { %v907_v0 = vadd.f32 %v895_v51, %v888_v56  ;;  %v889_v60 = vmul.f32 %v880_v52, %v870_v57 }
 0x29c   :  { %v909_v61 = vadd.f32 %v903_v55, %v890_v59 }
 0x29d   :  { %v908_v62 = vadd.f32 %v899_v58, %v889_v60  ;;  %v913_v63 = vmul.f32 0.044715, %v907_v0  ;;  %v910_v17 = vmul.f32 0.5, %v907_v0 }
 0x29e   :  { %v915_v1 = vmul.f32 0.044715, %v909_v61  ;;  %v912_v19 = vmul.f32 0.5, %v909_v61 }
 0x29f   :  { %v914_v2 = vmul.f32 0.044715, %v908_v62  ;;  %v916_v3 = vmul.f32 %v913_v63, %v907_v0  ;;  %v911_v21 = vmul.f32 0.5, %v908_v62 }
 0x2a0   :  { %v918_v37 = vmul.f32 %v915_v1, %v909_v61 }
 0x2a1   :  { %v917_v4 = vmul.f32 %v914_v2, %v908_v62  ;;  %v919_v5 = vmul.f32 %v916_v3, %v907_v0 }
 0x2a2   :  { %v921_v6 = vmul.f32 %v918_v37, %v909_v61 }
 0x2a3   :  { %v920_v7 = vmul.f32 %v917_v4, %v908_v62  ;;  %v922_v8 = vadd.f32 %v919_v5, %v907_v0 }
 0x2a4   :  { %v924_v41 = vadd.f32 %v921_v6, %v909_v61 }
 0x2a5   :  { %v923_v10 = vadd.f32 %v920_v7, %v908_v62  ;;  %v925_v12 = vmul.f32 0.7978846, %v922_v8 }
 0x2a6   :  { %v927_v13 = vmul.f32 0.7978846, %v924_v41 }
 0x2a7   :  { %v926_v39 = vmul.f32 0.7978846, %v923_v10  ;;  %1249 = vtanh.f32 %v925_v12 }
 0x2a8   :  { %1251 = vtanh.f32 %v927_v13 }
 0x2a9   :  { %1253 = vtanh.f32 %v926_v39 }
 0x2b1   :  { %v1250_v14 = vpop.eup %1249 }
 0x2b2   :  { %v1252_v16 = vpop.eup %1251  ;;  %v931_v18 = vadd.f32 1.0, %v1250_v14 }
 0x2b3   :  { %v1254_v15 = vpop.eup %1253  ;;  %v933_v20 = vadd.f32 1.0, %v1252_v16 }
 0x2b4   :  { %v932_v22 = vadd.f32 1.0, %v1254_v15  ;;  %v934_v23 = vmul.f32 %v931_v18, %v910_v17 }
 0x2b5   :  { %v936_v24 = vmul.f32 %v933_v20, %v912_v19 }
 0x2b6   :  { %v935_v25 = vmul.f32 %v932_v22, %v911_v21  ;;  %937 = vst [vmem:[#allocation10] sm:$0xff] %v934_v23 }
 0x2b7   :  { %939 = vst [vmem:[#allocation10 + $0x10] sm:$0xff] %v936_v24 }
 0x2b8   :  { %938 = vst [vmem:[#allocation10 + $0x8] sm:$0xff] %v935_v25 }
 0x2b9   :  { %1354 = shalt.err (!%p1351_p8)
}
 0x2ba   :  { %s1355_s23 = scalar_lea.hbm %s1539_s5, 384 }
 0x2bb   :  { %p1356_p9 = scmp.ne.s32.totalorder %s1539_s5, %s1355_s23  ;;  %p1359_p10 = scmp.lt.u32.totalorder %s1355_s23, %s1539_s5 }
 0x2bd   :  { %p1361_p11 = pnand %p1359_p10, %p1356_p9 }
 0x2bf   :  { %1364 = shalt.err (!%p1361_p11)
}
 0x2c0   :  { %949 = dma.vmem_to_hbm [thread:$0]  %s947_s19, 384, %s1539_s5, [#allocation4]  }
 0x2c1   :  { %1371 = dma.done.wait [#allocation4], 384  }
 0x2c2   :  { %1372 = vsyncadd [#allocation4], 4294966912 }
 0x2c3   :  { %953 = vsyncpa [#allocation3], 1 }
 0x2c4   :  { %954 = vsyncpa [#allocation6], 1 }
 0x2c5   :  { %955 = vsyncpa [#allocation9], 1 }
 0x2c6   :  { %956 = vsyncpa [#allocation4], 1 }

</bundles_post_ra>
